<compile_context>
chip_gen: v7x
topology: tpu7x:2x2x1
jax: 0.10.0
libtpu: 0.0.40
codegen_flags: <defaults>
</compile_context>

<pallas_src>
import functools

import jax
import jax.numpy as jnp
from jax.experimental import pallas as pl
from jax.experimental.pallas import tpu as pltpu


def _round_up(x: int, m: int) -> int:
    return ((x + m - 1) // m) * m


def ffn_kernel(x_ref, w1_ref, b1_ref, w2_ref, b2_ref, o_ref, acc_ref):
    """One (M tile, d_ff tile) step of the fused FFN.

    x_ref : (tm, d_model)   w1_ref: (d_model, tf)   b1_ref: (1, tf)
    w2_ref: (tf, d_model)   b2_ref: (1, d_model)
    o_ref : (tm, d_model)   acc_ref: (tm, d_model) f32 scratch
    """
    f = pl.program_id(1)

    @pl.when(f == 0)
    def _init():
        acc_ref[...] = jnp.zeros_like(acc_ref)

    # First matmul on the MXU, f32 accumulation; bias + ReLU on the VPU.
    h = jnp.dot(x_ref[...], w1_ref[...], preferred_element_type=jnp.float32)
    h = jnp.maximum(h + b1_ref[...], 0.0)            # (tm, tf), only tile-sized

    # Second matmul: accumulate this d_ff slab's contribution.
    acc_ref[...] += jnp.dot(h.astype(w2_ref.dtype), w2_ref[...],
                            preferred_element_type=jnp.float32)

    # Lane-dense write-back: once per M tile, on the last reduction step only.
    @pl.when(f == pl.num_programs(1) - 1)
    def _finalize():
        o_ref[...] = (acc_ref[...] + b2_ref[...]).astype(o_ref.dtype)


@functools.partial(jax.jit, static_argnames=("tm", "tf"))
def feed_forward(x, w1, b1, w2, b2, *, tm: int = 256, tf: int = 512):
    """x: (batch, seq, d_model). Returns (batch, seq, d_model)."""
    batch, seq, d_model = x.shape
    d_ff = w1.shape[1]
    m = batch * seq
    x2d = x.reshape(m, d_model)

    # Clamp/align tile sizes so blocks satisfy the (8, 128) rule even for small
    # shapes. d_model is always a full-extent block dim (no constraint needed).
    tm_eff = min(tm, _round_up(m, 8))
    tf_eff = min(tf, _round_up(d_ff, 128))
    m_pad = _round_up(m, tm_eff)
    f_pad = _round_up(d_ff, tf_eff)

    if m_pad != m:
        x2d = jnp.pad(x2d, ((0, m_pad - m), (0, 0)))
    if f_pad != d_ff:
        # Zero-padded W1 columns + zero b1 -> relu(0)=0; zero W2 rows -> no
        # contribution to the accumulator. Exact result after slicing.
        w1 = jnp.pad(w1, ((0, 0), (0, f_pad - d_ff)))
        b1 = jnp.pad(b1, ((0, 0), (0, f_pad - d_ff)))
        w2 = jnp.pad(w2, ((0, f_pad - d_ff), (0, 0)))

    grid = (m_pad // tm_eff, f_pad // tf_eff)
    itemsize = jnp.dtype(x.dtype).itemsize

    cost = pl.CostEstimate(
        flops=4 * m * d_model * d_ff,          # two matmuls
        transcendentals=0,
        bytes_accessed=(x2d.size + w1.size + b1.size + w2.size + b2.size
                        + m_pad * d_model) * itemsize,
    )

    out2d = pl.pallas_call(
        ffn_kernel,
        out_shape=jax.ShapeDtypeStruct((m_pad, d_model), x.dtype),
        grid_spec=pltpu.PrefetchScalarGridSpec(
            num_scalar_prefetch=0,
            grid=grid,
            in_specs=[
                # Activations: index on M only (reused across d_ff steps).
                pl.BlockSpec((tm_eff, d_model), lambda i, f: (i, 0)),
                # Weights/biases: index on d_ff only (reused across M tiles).
                pl.BlockSpec((d_model, tf_eff), lambda i, f: (0, f)),
                pl.BlockSpec((1, tf_eff), lambda i, f: (0, f)),
                pl.BlockSpec((tf_eff, d_model), lambda i, f: (f, 0)),
                pl.BlockSpec((1, d_model), lambda i, f: (0, 0)),
            ],
            # Output tile is constant along the reduction axis (accumulator).
            out_specs=pl.BlockSpec((tm_eff, d_model), lambda i, f: (i, 0)),
            scratch_shapes=[pltpu.VMEM((tm_eff, d_model), jnp.float32)],
        ),
        compiler_params=pltpu.CompilerParams(
            dimension_semantics=("parallel", "arbitrary"),
            vmem_limit_bytes=64 * 1024 * 1024,
        ),
        cost_estimate=cost,
    )(x2d, w1, b1, w2, b2)

    return out2d[:m].reshape(batch, seq, d_model)


def init_params(key, d_model, d_ff, dtype=jnp.float32):
    # Deterministic init mimicking nn.Linear's uniform(-1/sqrt(fan_in), ...).
    k1, k2, k3, k4 = jax.random.split(key, 4)
    bound1 = 1.0 / (d_model ** 0.5)
    bound2 = 1.0 / (d_ff ** 0.5)
    w1 = jax.random.uniform(k1, (d_model, d_ff), dtype, -bound1, bound1)
    b1 = jax.random.uniform(k2, (1, d_ff), dtype, -bound1, bound1)
    w2 = jax.random.uniform(k3, (d_ff, d_model), dtype, -bound2, bound2)
    b2 = jax.random.uniform(k4, (1, d_model), dtype, -bound2, bound2)
    return w1, b1, w2, b2


if __name__ == "__main__":
    batch, seq, d_model, d_ff = 2, 8, 32, 64

    key = jax.random.PRNGKey(0)
    kx, kp = jax.random.split(key)
    x = jax.random.normal(kx, (batch, seq, d_model), jnp.float32)
    w1, b1, w2, b2 = init_params(kp, d_model, d_ff)

    out = feed_forward(x, w1, b1, w2, b2)
    out = jax.block_until_ready(out)

    # Pure-JAX reference check.
    ref = jnp.maximum(x.reshape(-1, d_model) @ w1 + b1, 0.0) @ w2 + b2
    ref = ref.reshape(batch, seq, d_model)
    assert out.shape == (batch, seq, d_model)
    assert jnp.allclose(out, ref, atol=1e-5, rtol=1e-5)

    print("KERNEL_OK")
</pallas_src>

<mosaic_0001>
module attributes {stable_mosaic.version = 11 : i64} {
  func.func @ffn_kernel(%arg0: i32, %arg1: i32, %arg2: memref<16x32xf32, #tpu.memory_space<vmem>>, %arg3: memref<32x128xf32, #tpu.memory_space<vmem>>, %arg4: memref<1x128xf32, #tpu.memory_space<vmem>>, %arg5: memref<128x32xf32, #tpu.memory_space<vmem>>, %arg6: memref<1x32xf32, #tpu.memory_space<vmem>>, %arg7: memref<16x32xf32, #tpu.memory_space<vmem>>, %arg8: memref<16x32xf32, #tpu.memory_space<vmem>>) attributes {dimension_semantics = [#tpu.dimension_semantics<parallel>, #tpu.dimension_semantics<arbitrary>], iteration_bounds = array<i64: 1, 1>, scalar_prefetch = 0 : i64, scratch_operands = 1 : i64, tpu.core_type = #tpu.core_type<tc>, window_params = [{transform_indices = @transform_0, window_bounds = array<i64: 16, 32>}, {transform_indices = @transform_1, window_bounds = array<i64: 32, 128>}, {transform_indices = @transform_2, window_bounds = array<i64: 1, 128>}, {transform_indices = @transform_3, window_bounds = array<i64: 128, 32>}, {pipeline_mode = #tpu.pipeline_mode<synchronous>, transform_indices = @transform_4, window_bounds = array<i64: 1, 32>}, {transform_indices = @transform_5, window_bounds = array<i64: 16, 32>}]} {
    %c0_i32 = arith.constant 0 : i32
    %0 = arith.cmpi eq, %arg1, %c0_i32 : i32
    %1 = arith.extui %0 : i1 to i32
    %c0_i32_0 = arith.constant 0 : i32
    %2 = arith.cmpi ne, %1, %c0_i32_0 : i32
    scf.if %2 {
      %cst_16 = arith.constant 0.000000e+00 : f32
      %19 = vector.broadcast %cst_16 : f32 to vector<16x32xf32>
      %c0_17 = arith.constant 0 : index
      %c0_18 = arith.constant 0 : index
      %20 = vector.load %arg8[%c0_17, %c0_18] : memref<16x32xf32, #tpu.memory_space<vmem>>, vector<16x32xf32>
      tpu.vector_store %arg8[%c0_17, %c0_18], %19 {strides = array<i32>} : memref<16x32xf32, #tpu.memory_space<vmem>>, vector<16x32xf32>,
    } else {
    }
    %c0 = arith.constant 0 : index
    %c0_1 = arith.constant 0 : index
    %3 = vector.load %arg2[%c0, %c0_1] : memref<16x32xf32, #tpu.memory_space<vmem>>, vector<16x32xf32>
    %c0_2 = arith.constant 0 : index
    %c0_3 = arith.constant 0 : index
    %4 = vector.load %arg3[%c0_2, %c0_3] : memref<32x128xf32, #tpu.memory_space<vmem>>, vector<32x128xf32>
    %cst = arith.constant dense<0.000000e+00> : vector<16x128xf32>
    %5 = tpu.matmul %3, %4, %cst {dimension_numbers = #tpu.dot_dimension_numbers<[1], [0], [0], [1], [0, 0, 1, 1], [], []>} : vector<16x32xf32>, vector<32x128xf32>, vector<16x128xf32> -> vector<16x128xf32>
    %c0_4 = arith.constant 0 : index
    %c0_5 = arith.constant 0 : index
    %6 = vector.load %arg4[%c0_4, %c0_5] : memref<1x128xf32, #tpu.memory_space<vmem>>, vector<1x128xf32>
    %7 = vector.broadcast %6 : vector<1x128xf32> to vector<16x128xf32>
    %8 = arith.addf %5, %7 : vector<16x128xf32>
    %cst_6 = arith.constant 0.000000e+00 : f32
    %9 = vector.broadcast %cst_6 : f32 to vector<16x128xf32>
    %10 = arith.maximumf %8, %9 : vector<16x128xf32>
    %c0_7 = arith.constant 0 : index
    %c0_8 = arith.constant 0 : index
    %11 = vector.load %arg8[%c0_7, %c0_8] : memref<16x32xf32, #tpu.memory_space<vmem>>, vector<16x32xf32>
    %c0_9 = arith.constant 0 : index
    %c0_10 = arith.constant 0 : index
    %12 = vector.load %arg5[%c0_9, %c0_10] : memref<128x32xf32, #tpu.memory_space<vmem>>, vector<128x32xf32>
    %cst_11 = arith.constant dense<0.000000e+00> : vector<16x32xf32>
    %13 = tpu.matmul %10, %12, %cst_11 {dimension_numbers = #tpu.dot_dimension_numbers<[1], [0], [0], [1], [0, 0, 1, 1], [], []>} : vector<16x128xf32>, vector<128x32xf32>, vector<16x32xf32> -> vector<16x32xf32>
    %14 = arith.addf %11, %13 : vector<16x32xf32>
    %c0_12 = arith.constant 0 : index
    %c0_13 = arith.constant 0 : index
    %15 = vector.load %arg8[%c0_12, %c0_13] : memref<16x32xf32, #tpu.memory_space<vmem>>, vector<16x32xf32>
    tpu.vector_store %arg8[%c0_12, %c0_13], %14 {strides = array<i32>} : memref<16x32xf32, #tpu.memory_space<vmem>>, vector<16x32xf32>,
    %c0_i32_14 = arith.constant 0 : i32
    %16 = arith.cmpi eq, %arg1, %c0_i32_14 : i32
    %17 = arith.extui %16 : i1 to i32
    %c0_i32_15 = arith.constant 0 : i32
    %18 = arith.cmpi ne, %17, %c0_i32_15 : i32
    scf.if %18 {
      %c0_16 = arith.constant 0 : index
      %c0_17 = arith.constant 0 : index
      %19 = vector.load %arg8[%c0_16, %c0_17] : memref<16x32xf32, #tpu.memory_space<vmem>>, vector<16x32xf32>
      %c0_18 = arith.constant 0 : index
      %c0_19 = arith.constant 0 : index
      %20 = vector.load %arg6[%c0_18, %c0_19] : memref<1x32xf32, #tpu.memory_space<vmem>>, vector<1x32xf32>
      %21 = vector.broadcast %20 : vector<1x32xf32> to vector<16x32xf32>
      %22 = arith.addf %19, %21 : vector<16x32xf32>
      %c0_20 = arith.constant 0 : index
      %c0_21 = arith.constant 0 : index
      %23 = vector.load %arg7[%c0_20, %c0_21] : memref<16x32xf32, #tpu.memory_space<vmem>>, vector<16x32xf32>
      tpu.vector_store %arg7[%c0_20, %c0_21], %22 {strides = array<i32>} : memref<16x32xf32, #tpu.memory_space<vmem>>, vector<16x32xf32>,
    } else {
    }
    return
  }
  func.func @transform_0(%arg0: i32, %arg1: i32) -> (i32, i32) {
    %c0_i32 = arith.constant 0 : i32
    %c0_i32_0 = arith.constant 0 : i32
    return %arg0, %c0_i32 : i32, i32
  }
  func.func @transform_1(%arg0: i32, %arg1: i32) -> (i32, i32) {
    %c0_i32 = arith.constant 0 : i32
    %c0_i32_0 = arith.constant 0 : i32
    return %c0_i32, %arg1 : i32, i32
  }
  func.func @transform_2(%arg0: i32, %arg1: i32) -> (i32, i32) {
    %c0_i32 = arith.constant 0 : i32
    %c0_i32_0 = arith.constant 0 : i32
    return %c0_i32, %arg1 : i32, i32
  }
  func.func @transform_3(%arg0: i32, %arg1: i32) -> (i32, i32) {
    %c0_i32 = arith.constant 0 : i32
    %c0_i32_0 = arith.constant 0 : i32
    return %arg1, %c0_i32 : i32, i32
  }
  func.func @transform_4(%arg0: i32, %arg1: i32) -> (i32, i32) {
    %c0_i32 = arith.constant 0 : i32
    %c0_i32_0 = arith.constant 0 : i32
    %c0_i32_1 = arith.constant 0 : i32
    return %c0_i32, %c0_i32_0 : i32, i32
  }
  func.func @transform_5(%arg0: i32, %arg1: i32) -> (i32, i32) {
    %c0_i32 = arith.constant 0 : i32
    %c0_i32_0 = arith.constant 0 : i32
    return %arg0, %c0_i32 : i32, i32
  }
}

</mosaic_0001>

<bundles_post_ra>
// kernel: feed_forward.1
= control target key start
LH: loop header
LB: loop body
LE: loop exit
PB: predicated region body
PF: predicated region fallthrough
CT: control target
= control target key end

     0   :  { %10 = vsyncpa [#allocation4], 0  ;;  %s722_s0 = inlined_call_operand.hbm [shape: f32[16,32], index: 0, kind: input, shape index: {}]   ;;  %s723_s1 = inlined_call_operand.hbm [shape: f32[32,128], index: 1, kind: input, shape index: {}]   ;;  %s724_s2 = inlined_call_operand.hbm [shape: f32[1,128], index: 2, kind: input, shape index: {}]   ;;  %s725_s3 = inlined_call_operand.hbm [shape: f32[128,32], index: 3, kind: input, shape index: {}]   ;;  %s726_s4 = inlined_call_operand.hbm [shape: f32[1,32], index: 4, kind: input, shape index: {}]   ;;  %s727_s5 = inlined_call_operand.hbm [shape: f32[16,32], index: 5, kind: output, shape index: {}]  }
   0x1   :  { %11 = vsyncpa [#allocation7], 0 }
   0x2   :  { %12 = vsyncpa [#allocation10], 0 }
   0x3   :  { %13 = vsyncpa [#allocation5], 0  ;;  %s584_s18 = smov [#allocation6]   ;;  %s585_s20 = smov [#allocation9]  }
   0x4   :  { %s31_s19 = sshll.u32 %s584_s18, 4  ;;  %s53_s21 = sshll.u32 %s585_s20, 4  ;;  %s32_s19 = int_to_ptr.vmem [resolvable:$true] %s31_s19  ;;  %s623_s21 = int_to_ptr.vmem [resolvable:$true] %s53_s21 }
   0x5   :  { %s444_s24 = scalar_lea.hbm %s723_s1, 512 }
   0x6   :  { %p445_p0 = scmp.ne.s32.totalorder %s723_s1, %s444_s24  ;;  %p448_p1 = scmp.lt.u32.totalorder %s444_s24, %s723_s1 }
   0x8   :  { %p450_p2 = pnand %p448_p1, %p445_p0 }
   0xa   :  { %453 = shalt.err (!%p450_p2)
}
   0xb   :  { %s454_s29 = scalar_lea.vmem %s32_s19, 512  ;;  %p459_p4 = scmp.lt.s32.totalorder %s32_s19, %s32_s19 }
   0xc   :  { %p455_p3 = scmp.ne.s32.totalorder %s32_s19, %s454_s29  ;;  %p460_p5 = scmp.lt.s32.totalorder %s454_s29, %s454_s29 }
   0xe   :  { %p461_p6 = por %p460_p5, %p459_p4 }
  0x10   :  { %p462_p7 = pnand %p461_p6, %p455_p3 }
  0x12   :  { %465 = shalt.err (!%p462_p7)
}
  0x13   :  { %s586_s30 = smov 128   ;;  %s587_s6 = smov 8  }
  0x14   :  { %37 = dma.hbm_to_vmem [thread:$0]  %s723_s1, 512, %s32_s19, [#allocation7], %s586_s30, %s586_s30, %s587_s6  }
  0x15   :  { %s466_s11 = scalar_lea.hbm %s725_s3, 2048 }
  0x16   :  { %p467_p8 = scmp.ne.s32.totalorder %s725_s3, %s466_s11  ;;  %p470_p9 = scmp.lt.u32.totalorder %s466_s11, %s725_s3 }
  0x18   :  { %p472_p10 = pnand %p470_p9, %p467_p8 }
  0x1a   :  { %475 = shalt.err (!%p472_p10)
}
  0x1b   :  { %s476_s16 = scalar_lea.vmem %s623_s21, 2048  ;;  %p481_p12 = scmp.lt.s32.totalorder %s623_s21, %s623_s21 }
  0x1c   :  { %p477_p11 = scmp.ne.s32.totalorder %s623_s21, %s476_s16  ;;  %p482_p13 = scmp.lt.s32.totalorder %s476_s16, %s476_s16 }
  0x1e   :  { %p483_p0 = por %p482_p13, %p481_p12 }
  0x20   :  { %p484_p1 = pnand %p483_p0, %p477_p11 }
  0x22   :  { %487 = shalt.err (!%p484_p1)
}
  0x23   :  { %59 = dma.hbm_to_vmem [thread:$0]  %s725_s3, 2048, %s623_s21, [#allocation10], %s586_s30, %s586_s30, %s587_s6  }
  0x24   :  { %s588_s18 = smov [#allocation3]   ;;  %s589_s20 = smov [#allocation8]  }
  0x25   :  { %s19_s19 = sshll.u32 %s588_s18, 4  ;;  %s44_s22 = sshll.u32 %s589_s20, 4  ;;  %s20_s19 = int_to_ptr.vmem [resolvable:$true] %s19_s19  ;;  %s45_s22 = int_to_ptr.vmem [resolvable:$true] %s44_s22 }
  0x26   :  { %s488_s25 = scalar_lea.hbm %s722_s0, 256 }
  0x27   :  { %p489_p2 = scmp.ne.s32.totalorder %s722_s0, %s488_s25  ;;  %p492_p3 = scmp.lt.u32.totalorder %s488_s25, %s722_s0 }
  0x29   :  { %p494_p4 = pnand %p492_p3, %p489_p2 }
  0x2b   :  { %497 = shalt.err (!%p494_p4)
}
  0x2c   :  { %s498_s3 = scalar_lea.vmem %s20_s19, 256  ;;  %p503_p6 = scmp.lt.s32.totalorder %s20_s19, %s20_s19 }
  0x2d   :  { %p499_p5 = scmp.ne.s32.totalorder %s20_s19, %s498_s3  ;;  %p504_p7 = scmp.lt.s32.totalorder %s498_s3, %s498_s3 }
  0x2f   :  { %p505_p8 = por %p504_p7, %p503_p6 }
  0x31   :  { %p506_p9 = pnand %p505_p8, %p499_p5 }
  0x33   :  { %509 = shalt.err (!%p506_p9)
}
  0x34   :  { %25 = dma.hbm_to_vmem [thread:$0]  %s722_s0, 256, %s20_s19, [#allocation4], %s586_s30, %s586_s30, %s587_s6  }
  0x35   :  { %s510_s10 = scalar_lea.hbm %s724_s2, 16 }
  0x36   :  { %p511_p10 = scmp.ne.s32.totalorder %s724_s2, %s510_s10  ;;  %p514_p11 = scmp.lt.u32.totalorder %s510_s10, %s724_s2 }
  0x38   :  { %p516_p12 = pnand %p514_p11, %p511_p10 }
  0x3a   :  { %519 = shalt.err (!%p516_p12)
}
  0x3b   :  { %s520_s15 = scalar_lea.vmem %s45_s22, 16  ;;  %s524_s16 = scalar_lea.vmem %s45_s22, 32 }
  0x3c   :  { %p521_p13 = scmp.ne.s32.totalorder %s45_s22, %s520_s15  ;;  %p525_p0 = scmp.lt.s32.totalorder %s45_s22, %s45_s22 }
  0x3d   :  { %p526_p1 = scmp.lt.s32.totalorder %s524_s16, %s520_s15 }
  0x3f   :  { %p527_p2 = por %p526_p1, %p525_p0 }
  0x41   :  { %p528_p3 = pnand %p527_p2, %p521_p13 }
  0x43   :  { %531 = shalt.err (!%p528_p3)
}
  0x44   :  { %47 = dma.hbm_to_vmem [thread:$0]  %s724_s2, 16, %s45_s22, [#allocation7]  }
  0x45   :  { %s590_s17 = smov [#allocation11]   ;;  %s532_s23 = scalar_lea.hbm %s726_s4, 16 }
  0x46   :  { %s66_s18 = sshll.u32 %s590_s17, 4  ;;  %p533_p4 = scmp.ne.s32.totalorder %s726_s4, %s532_s23  ;;  %s67_s18 = int_to_ptr.vmem [resolvable:$true] %s66_s18 }
  0x47   :  { %p536_p5 = scmp.lt.u32.totalorder %s532_s23, %s726_s4 }
  0x49   :  { %p538_p6 = pnand %p536_p5, %p533_p4 }
  0x4b   :  { %541 = shalt.err (!%p538_p6)
}
  0x4c   :  { %s542_s28 = scalar_lea.vmem %s67_s18, 16  ;;  %s546_s2 = scalar_lea.vmem %s67_s18, 32 }
  0x4d   :  { %p543_p7 = scmp.ne.s32.totalorder %s67_s18, %s542_s28  ;;  %p547_p8 = scmp.lt.s32.totalorder %s67_s18, %s67_s18 }
  0x4e   :  { %p548_p9 = scmp.lt.s32.totalorder %s546_s2, %s542_s28 }
  0x50   :  { %p549_p10 = por %p548_p9, %p547_p8 }
  0x52   :  { %p550_p11 = pnand %p549_p10, %p543_p7 }
  0x54   :  { %553 = shalt.err (!%p550_p11)
}
  0x55   :  { %69 = dma.hbm_to_vmem [thread:$0]  %s726_s4, 16, %s67_s18, [#allocation10]  }
  0x56   :  { %576 = dma.done.wait [#allocation4], 256  }
  0x57   :  { %577 = vsyncadd [#allocation4], 4294967040 }
  0x58   :  { %578 = dma.done.wait [#allocation7], 528  }
  0x59   :  { %579 = vsyncadd [#allocation7], 4294966768 }
  0x5a   :  { %580 = dma.done.wait [#allocation10], 2064  }
  0x5b   :  { %581 = vsyncadd [#allocation10], 4294965232  ;;  %vm89_vm0 = vcmask 261120   ;;  %v94_v0 = vld [vmem:[#allocation6] sm:$0xff]  ;;  %v95_v1 = vld [vmem:[#allocation6 + $0x8] sm:$0xff]  ;;  %v591_v32 = vmov 0.0  }
  0x5c   :  { %v96_v2 = vld [vmem:[#allocation6 + $0x10] sm:$0xff]  ;;  %v395_v3 = vpack.c.bf16 %v95_v1, %v94_v0  ;;  %v97_v4 = vld [vmem:[#allocation6 + $0x18] sm:$0xff]  ;;  %v191_v7 = vld [vmem:[#allocation9] sm:$0xff]  ;;  %91 = vst.msk [vmem:[#allocation2 + $0x8] sm:$0xff] %vm89_vm0, %v591_v32  ;;  %s592_s4 = smov [#allocation12]  }
  0x5d   :  { %v92_v5 = vld [vmem:[#allocation3] sm:$0xff]  ;;  %v399_v6 = vpack.c.bf16 %v97_v4, %v96_v2  ;;  %v194_v11 = vld [vmem:[#allocation9 + $0x18] sm:$0xff]  ;;  %v195_v13 = vld [vmem:[#allocation9 + $0x20] sm:$0xff]  ;;  %90 = vst.msk [vmem:[#allocation2] sm:$0xff] %vm89_vm0, %v591_v32  ;;  %s307_s3 = sshll.u32 %s592_s4, 4  ;;  %s308_s3 = int_to_ptr.vmem [resolvable:$true] %s307_s3 }
  0x5e   :  { %357 = vmatprep.mubr.msk.f32.mxu0 %vm89_vm0, %v92_v5  ;;  %v192_v8 = vld [vmem:[#allocation9 + $0x8] sm:$0xff]  ;;  %v193_v9 = vld [vmem:[#allocation9 + $0x10] sm:$0xff]  ;;  %396 = vmatprep.subr.bf16.mxu0 %v395_v3  ;;  %v198_v18 = vld [vmem:[#allocation9 + $0x38] sm:$0xff]  ;;  %s554_s21 = scalar_lea.vmem %s308_s3, 256  ;;  %p559_p13 = scmp.lt.s32.totalorder %s308_s3, %s308_s3 }
  0x5f   :  { %v403_v10 = vpack.c.bf16 %v192_v8, %v191_v7  ;;  %398 = vmatpush3.bf16.msra.mxu0 %v395_v3  ;;  %v407_v12 = vpack.c.bf16 %v194_v11, %v193_v9  ;;  %v196_v14 = vld [vmem:[#allocation9 + $0x28] sm:$0xff]  ;;  %v93_v16 = vld [vmem:[#allocation3 + $0x8] sm:$0xff]  ;;  %v199_v20 = vld [vmem:[#allocation9 + $0x40] sm:$0xff]  ;;  %p555_p12 = scmp.ne.s32.totalorder %s308_s3, %s554_s21  ;;  %p560_p0 = scmp.lt.s32.totalorder %s554_s21, %s554_s21 }
  0x60   :  { %400 = vmatprep.subr.bf16.mxu0 %v399_v6  ;;  %v411_v15 = vpack.c.bf16 %v196_v14, %v195_v13  ;;  %v197_v17 = vld [vmem:[#allocation9 + $0x30] sm:$0xff]  ;;  %v200_v21 = vld [vmem:[#allocation9 + $0x48] sm:$0xff]  ;;  %v202_v24 = vld [vmem:[#allocation9 + $0x58] sm:$0xff] }
  0x61   :  { %404 = vmatprep.subr.bf16.mxu1 %v403_v10  ;;  %v415_v19 = vpack.c.bf16 %v198_v18, %v197_v17  ;;  %v419_v22 = vpack.c.bf16 %v200_v21, %v199_v20  ;;  %v201_v23 = vld [vmem:[#allocation9 + $0x50] sm:$0xff]  ;;  %v203_v26 = vld [vmem:[#allocation9 + $0x60] sm:$0xff]  ;;  %v204_v27 = vld [vmem:[#allocation9 + $0x68] sm:$0xff]  ;;  %p561_p1 = por %p560_p0, %p559_p13 }
  0x62   :  { %406 = vmatpush3.bf16.msra.mxu1 %v403_v10  ;;  %v423_v25 = vpack.c.bf16 %v202_v24, %v201_v23  ;;  %v427_v28 = vpack.c.bf16 %v204_v27, %v203_v26  ;;  %v205_v29 = vld [vmem:[#allocation9 + $0x70] sm:$0xff]  ;;  %v206_v30 = vld [vmem:[#allocation9 + $0x78] sm:$0xff]  ;;  %v324_v46 = vld [vmem:[#allocation11] ss:$0 sm:$0xff] }
  0x63   :  { %408 = vmatprep.subr.bf16.mxu1 %v407_v12  ;;  %402 = vmatpush3.bf16.msra.mxu0 %v399_v6  ;;  %v431_v31 = vpack.c.bf16 %v206_v30, %v205_v29  ;;  %v321_v33 = vld [vmem:[#allocation8] ss:$0 sm:$0xff]  ;;  %v190_v40 = vld [vmem:[#allocation2 + $0x8] sm:$0xff]  ;;  %p562_p2 = pnand %p561_p1, %p555_p12 }
  0x64   :  { %v189_v41 = vld [vmem:[#allocation2] sm:$0xff] }
  0x66   :  { %410 = vmatpush3.bf16.msra.mxu1 %v407_v12  ;;  %358 = vmatmul.mubr.msk.f32.vlgmr.msra.gmra.mrb[0].mxu0 %vm89_vm0, %v93_v16 }
  0x67   :  { %412 = vmatprep.subr.bf16.mxu1 %v411_v15 }
  0x6a   :  { %414 = vmatpush3.bf16.msra.mxu1 %v411_v15 }
  0x6b   :  { %416 = vmatprep.subr.bf16.mxu1 %v415_v19 }
  0x6e   :  { %418 = vmatpush3.bf16.msra.mxu1 %v415_v19 }
  0x6f   :  { %420 = vmatprep.subr.bf16.mxu1 %v419_v22 }
  0x72   :  { %422 = vmatpush3.bf16.msra.mxu1 %v419_v22 }
  0x73   :  { %424 = vmatprep.subr.bf16.mxu1 %v423_v25 }
  0x76   :  { %426 = vmatpush3.bf16.msra.mxu1 %v423_v25 }
  0x77   :  { %428 = vmatprep.subr.bf16.mxu1 %v427_v28 }
  0x7a   :  { %430 = vmatpush3.bf16.msra.mxu1 %v427_v28 }
  0x7b   :  { %432 = vmatprep.subr.bf16.mxu1 %v431_v31 }
  0x7e   :  { %434 = vmatpush3.bf16.msra.mxu1 %v431_v31 }
 0x139   :  { %v359_v34 = vpop.f32.mrb[0].mxu0 }
 0x13a   :  { %v184_v35 = vadd.f32 %v359_v34, %v321_v33  ;;  %v178_v36 = vpop.f32.mrb[1].mxu0 }
 0x13b   :  { %v179_v37 = vadd.f32 %v321_v33, %v178_v36 }
 0x13c   :  { %v188_v39 = vmax.f32 %v184_v35, 0.0 }
 0x13d   :  { %v187_v38 = vmax.f32 %v179_v37, 0.0 }
 0x13f   :  { %392 = vmatprep.mubr.f32.mxu1 %v187_v38 }
 0x140   :  { %393 = vmatmul.mubr.f32.vlgmr.msra.gmra.mrb[0].mxu1 %v188_v39 }
 0x213   :  { %v394_v42 = vpop.f32.mrb[0].mxu1 }
 0x214   :  { %v283_v43 = vadd.f32 %v394_v42, %v190_v40  ;;  %v273_v44 = vpop.f32.mrb[1].mxu1 }
 0x215   :  { %v282_v45 = vadd.f32 %v273_v44, %v189_v41 }
 0x216   :  { %285 = vst.msk [vmem:[#allocation2 + $0x8] sm:$0xff] %vm89_vm0, %v283_v43 }
 0x217   :  { %284 = vst.msk [vmem:[#allocation2] sm:$0xff] %vm89_vm0, %v282_v45 }
 0x21d   :  { %v290_v47 = vld [vmem:[#allocation2 + $0x8] sm:$0xff] }
 0x21e   :  { %v289_v48 = vld [vmem:[#allocation2] sm:$0xff]  ;;  %v299_v49 = vadd.f32 %v324_v46, %v290_v47 }
 0x21f   :  { %v298_v50 = vadd.f32 %v324_v46, %v289_v48 }
 0x220   :  { %301 = vst.msk [vmem:[#allocation12 + $0x8] sm:$0xff] %vm89_vm0, %v299_v49 }
 0x221   :  { %300 = vst.msk [vmem:[#allocation12] sm:$0xff] %vm89_vm0, %v298_v50 }
 0x222   :  { %565 = shalt.err (!%p562_p2)
}
 0x223   :  { %s566_s9 = scalar_lea.hbm %s727_s5, 256 }
 0x224   :  { %p567_p3 = scmp.ne.s32.totalorder %s727_s5, %s566_s9  ;;  %p570_p4 = scmp.lt.u32.totalorder %s566_s9, %s727_s5 }
 0x226   :  { %p572_p5 = pnand %p570_p4, %p567_p3 }
 0x228   :  { %575 = shalt.err (!%p572_p5)
}
 0x229   :  { %313 = dma.vmem_to_hbm [thread:$0]  %s308_s3, 256, %s727_s5, [#allocation5], %s586_s30, %s586_s30, %s587_s6  }
 0x22a   :  { %582 = dma.done.wait [#allocation5], 256  }
 0x22b   :  { %583 = vsyncadd [#allocation5], 4294967040 }
 0x22c   :  { %317 = vsyncpa [#allocation4], 1 }
 0x22d   :  { %318 = vsyncpa [#allocation7], 1 }
 0x22e   :  { %319 = vsyncpa [#allocation10], 1 }
 0x22f   :  { %320 = vsyncpa [#allocation5], 1 }

</bundles_post_ra>
